<compile_context>
chip_gen: v7x
topology: tpu7x:2x2x1
jax: 0.10.0
libtpu: 0.0.40
codegen_flags: <defaults>
</compile_context>

<pallas_src>
import jax
import jax.numpy as jnp
from jax import lax
from jax.experimental import pallas as pl
from jax.experimental.pallas import tpu as pltpu


_INV_SQRT2 = 0.7071067811865476


def _gelu_exact(h):
    # nn.GELU() default (approximate='none'): 0.5 * x * (1 + erf(x / sqrt(2)))
    return 0.5 * h * (1.0 + lax.erf(h * jnp.float32(_INV_SQRT2)))


# --------------- resident-weight kernel: grid = (M//tm,) ----------------------
def _mlp_resident_kernel(x_ref, w1_ref, b1_ref, w2_ref, b2_ref, o_ref):
    """One (tm, C) row tile; full W1/W2 are VMEM-resident across the grid."""
    h = jnp.dot(x_ref[...], w1_ref[...], preferred_element_type=jnp.float32)
    h = _gelu_exact(h + b1_ref[...])                        # (tm, H), f32
    y = jnp.dot(h.astype(w2_ref.dtype), w2_ref[...],
                preferred_element_type=jnp.float32)
    o_ref[...] = (y + b2_ref[...]).astype(o_ref.dtype)


# --------------- streaming kernel: grid = (M//tm, H//th) ----------------------
def _mlp_streaming_kernel(x_ref, w1_ref, b1_ref, w2_ref, b2_ref, o_ref, acc_ref):
    """Fallback when W1/W2 don't fit VMEM: hidden axis streamed + f32 accumulator."""
    h_idx = pl.program_id(1)

    @pl.when(h_idx == 0)
    def _init():
        acc_ref[...] = jnp.zeros_like(acc_ref)

    h = jnp.dot(x_ref[...], w1_ref[...], preferred_element_type=jnp.float32)
    h = _gelu_exact(h + b1_ref[...])                        # (tm, th), f32
    acc_ref[...] += jnp.dot(h.astype(w2_ref.dtype), w2_ref[...],
                            preferred_element_type=jnp.float32)

    @pl.when(h_idx == pl.num_programs(1) - 1)
    def _finalize():
        o_ref[...] = (acc_ref[...] + b2_ref[...]).astype(o_ref.dtype)


# ------------------------------- helpers --------------------------------------
def _round_up(x, m):
    return ((x + m - 1) // m) * m


def _pick_divisor_tile(dim, target, quantum):
    """Largest multiple of `quantum` <= target that divides dim (else dim)."""
    if dim <= target:
        return dim
    t = (min(target, dim) // quantum) * quantum
    while t >= quantum:
        if dim % t == 0:
            return t
        t -= quantum
    return dim


def _vmem_budget_bytes():
    """~0.8x per-core VMEM capacity (headroom for compiler scratch / buffers)."""
    cap = None
    try:
        cap = pltpu.get_tpu_info().vmem_capacity_bytes
    except Exception:
        cap = None
    if not cap:
        cap = 64 * 1024 * 1024          # conservative default (v7x per-TC VMEM)
    return max(32 << 20, min(int(cap * 0.8), 100 << 20))


# ------------------------------- wrapper ---------------------------------------
def mlp_pallas(x, w1, b1, w2, b2, *, tm=None, th=None,
               compute_dtype=jnp.bfloat16, force_streaming=False):
    """Fused nanoGPT MLP forward.

    x : (B, T, C)
    w1: (C, 4C)  c_fc weight, pre-transposed to (in, out)
    b1: (4C,)
    w2: (4C, C)  c_proj weight, pre-transposed to (in, out)
    b2: (C,)
    compute_dtype: matmul operand dtype (default bf16 -> MXU peak rate, half
        the weight HBM bytes).  Accumulation is always f32; the output keeps
        x.dtype.  Pass jnp.float32 (or None) for exact f32 matmuls.
    """
    B, T, C = x.shape
    H = w1.shape[1]
    assert w1.shape == (C, H) and w2.shape == (H, C)
    assert b1.shape == (H,) and b2.shape == (C,)
    M = B * T
    out_dtype = x.dtype

    if compute_dtype is not None:
        x = x.astype(compute_dtype)
        w1 = w1.astype(compute_dtype)
        w2 = w2.astype(compute_dtype)

    x2d = x.reshape(M, C)
    b1_2d = b1.astype(jnp.float32).reshape(1, H)
    b2_2d = b2.astype(jnp.float32).reshape(1, C)

    x_itm = x2d.dtype.itemsize
    w_itm = w1.dtype.itemsize
    o_itm = jnp.dtype(out_dtype).itemsize

    budget = _vmem_budget_bytes()
    headroom = 2 << 20

    # ---- can the full W1/W2 stay VMEM-resident for the whole kernel? ----
    tm_res = tm if tm is not None else min(_round_up(M, 16), 256)
    resident_need = (
        2 * (C * H + H * C) * w_itm            # weights (conservatively 2 buffers)
        + 2 * tm_res * C * (x_itm + o_itm)     # double-buffered x / out row tiles
        + 2 * (H + C) * 4                      # f32 biases
        + tm_res * H * 4 + tm_res * C * 4      # f32 GELU / matmul intermediates
        + headroom)
    use_resident = (not force_streaming) and (resident_need <= budget)

    if use_resident:
        tm_ = tm_res
        Mp = _round_up(M, tm_)
        if Mp != M:
            x2d = jnp.pad(x2d, ((0, Mp - M), (0, 0)))
        grid = (Mp // tm_,)
        in_specs = [
            pl.BlockSpec((tm_, C), lambda i: (i, 0)),   # x row tile (pipelined)
            pl.BlockSpec((C, H), lambda i: (0, 0)),     # W1: DMA'd once, resident
            pl.BlockSpec((1, H), lambda i: (0, 0)),     # b1
            pl.BlockSpec((H, C), lambda i: (0, 0)),     # W2: DMA'd once, resident
            pl.BlockSpec((1, C), lambda i: (0, 0)),     # b2
        ]
        out_specs = pl.BlockSpec((tm_, C), lambda i: (i, 0))
        scratch_shapes = []
        kernel = _mlp_resident_kernel
        dim_sem = ("parallel",)                 # v7x: each TC keeps its own weights
        weight_passes = 1
    else:
        # ---------------- streaming fallback ----------------
        if th is None:
            th_ = _pick_divisor_tile(H, 1024, 256)      # 256-aligned for 2x256 MXUs
            if H % th_ != 0:
                th_ = _pick_divisor_tile(H, 1024, 128)
        else:
            th_ = th
        if H % th_ != 0:
            raise ValueError(f"th={th_} must divide H={H}")

        if tm is None:
            tm_ = min(_round_up(M, 16), 1024)           # intensity ~ tm flop/byte

            def _need(t):
                return (2 * t * C * (x_itm + o_itm)
                        + 3 * (C * th_ + th_ * C) * w_itm     # Buffered(3) weights
                        + 2 * (th_ + C) * 4
                        + t * C * 4                            # f32 acc scratch
                        + t * th_ * 4 + t * C * 4              # f32 intermediates
                        + headroom)

            while tm_ > 256 and _need(tm_) > budget:
                tm_ //= 2
        else:
            tm_ = tm

        Mp = _round_up(M, tm_)
        if Mp != M:
            x2d = jnp.pad(x2d, ((0, Mp - M), (0, 0)))
        grid = (Mp // tm_, H // th_)

        deep = (H // th_) >= 3          # deeper pipelining on the dominant weight DMAs

        def _wspec(shape, index_map):
            if deep:
                return pl.BlockSpec(shape, index_map, pipeline_mode=pl.Buffered(3))
            return pl.BlockSpec(shape, index_map)

        in_specs = [
            pl.BlockSpec((tm_, C), lambda i, h: (i, 0)),   # x row tile
            _wspec((C, th_), lambda i, h: (0, h)),          # W1 hidden tile
            pl.BlockSpec((1, th_), lambda i, h: (0, h)),    # b1 hidden tile
            _wspec((th_, C), lambda i, h: (h, 0)),          # W2 hidden tile
            pl.BlockSpec((1, C), lambda i, h: (0, 0)),      # b2
        ]
        out_specs = pl.BlockSpec((tm_, C), lambda i, h: (i, 0))   # resident over h
        scratch_shapes = [pltpu.VMEM((tm_, C), jnp.float32)]      # c_proj accumulator
        kernel = _mlp_streaming_kernel
        dim_sem = ("parallel", "arbitrary")
        weight_passes = Mp // tm_

    cost = pl.CostEstimate(
        flops=4 * Mp * H * C,                       # two matmuls: 2*M*H*C each
        transcendentals=Mp * H,                     # erf over hidden activations
        bytes_accessed=(Mp * C * x_itm + Mp * C * o_itm
                        + weight_passes * (C * H + H * C) * w_itm
                        + (H + C) * 4),
    )

    out2d = pl.pallas_call(
        kernel,
        out_shape=jax.ShapeDtypeStruct((Mp, C), out_dtype),
        grid_spec=pltpu.PrefetchScalarGridSpec(
            num_scalar_prefetch=0,
            grid=grid,
            in_specs=in_specs,
            out_specs=out_specs,
            scratch_shapes=scratch_shapes,
        ),
        compiler_params=pltpu.CompilerParams(
            dimension_semantics=dim_sem,
            vmem_limit_bytes=budget,
        ),
        cost_estimate=cost,
    )(x2d, w1, b1_2d, w2, b2_2d)

    if Mp != M:
        out2d = out2d[:M]
    return out2d.reshape(B, T, C)


# --------------------------------- tests ----------------------------------------
def mlp_reference(x, w1, b1, w2, b2):
    x32 = x.astype(jnp.float32)
    h = jnp.einsum("btc,ch->bth", x32, w1.astype(jnp.float32),
                   precision="highest") + b1
    h = 0.5 * h * (1.0 + lax.erf(h / jnp.sqrt(2.0)))
    return jnp.einsum("bth,hc->btc", h, w2.astype(jnp.float32),
                      precision="highest") + b2


if __name__ == "__main__":
    # toy nanoGPT config: n_embd=32, bias=True, dropout=0.0 (eval: identity)
    B, T, C = 2, 8, 32
    H = 4 * C
    kx, k1, kb1, k2, kb2 = jax.random.split(jax.random.PRNGKey(0), 5)
    x = jax.random.normal(kx, (B, T, C), dtype=jnp.float32)
    w1 = jax.random.normal(k1, (C, H), dtype=jnp.float32) * 0.02   # stored as W.T vs PyTorch
    b1 = jax.random.normal(kb1, (H,), dtype=jnp.float32) * 0.02
    w2 = jax.random.normal(k2, (H, C), dtype=jnp.float32) * 0.02
    b2 = jax.random.normal(kb2, (C,), dtype=jnp.float32) * 0.02
    ref = mlp_reference(x, w1, b1, w2, b2)

    # 1) resident-weight path, exact f32 matmuls (matches nn.Linear/GELU closely)
    out_f32 = jax.block_until_ready(
        mlp_pallas(x, w1, b1, w2, b2, compute_dtype=jnp.float32))
    assert out_f32.shape == (B, T, C)
    assert jnp.allclose(out_f32, ref, atol=1e-5, rtol=1e-5), "f32 resident mismatch"

    # 2) resident-weight path, default bf16 operands + f32 accumulation (perf path)
    out_bf16 = jax.block_until_ready(mlp_pallas(x, w1, b1, w2, b2))
    assert out_bf16.dtype == x.dtype
    assert jnp.allclose(out_bf16, ref, atol=2e-2, rtol=2e-2), "bf16 resident mismatch"

    # 3) resident path with row padding (M=20 is not a row-tile multiple)
    xp = jax.random.normal(kx, (1, 20, C), dtype=jnp.float32)
    refp = mlp_reference(xp, w1, b1, w2, b2)
    outp = jax.block_until_ready(
        mlp_pallas(xp, w1, b1, w2, b2, compute_dtype=jnp.float32))
    assert outp.shape == (1, 20, C)
    assert jnp.allclose(outp, refp, atol=1e-5, rtol=1e-5), "padded-M mismatch"

    # 4) forced streaming fallback: multi row-tile x multi hidden-tile grid,
    #    exercises the f32 accumulator and Buffered(3) weight pipelining.
    B2, T2, C2 = 2, 64, 128
    H2 = 4 * C2
    kx, k1, kb1, k2, kb2 = jax.random.split(jax.random.PRNGKey(1), 5)
    x2 = jax.random.normal(kx, (B2, T2, C2), dtype=jnp.float32)
    w1b = jax.random.normal(k1, (C2, H2), dtype=jnp.float32) * 0.02
    b1b = jax.random.normal(kb1, (H2,), dtype=jnp.float32) * 0.02
    w2b = jax.random.normal(k2, (H2, C2), dtype=jnp.float32) * 0.02
    b2b = jax.random.normal(kb2, (C2,), dtype=jnp.float32) * 0.02
    ref2 = mlp_reference(x2, w1b, b1b, w2b, b2b)
    out2 = jax.block_until_ready(
        mlp_pallas(x2, w1b, b1b, w2b, b2b, tm=64, th=128,
                   compute_dtype=jnp.float32, force_streaming=True))
    assert jnp.allclose(out2, ref2, atol=1e-4, rtol=1e-4), "streaming mismatch"

    print("KERNEL_OK")
</pallas_src>

<mosaic_0001>
module attributes {stable_mosaic.version = 11 : i64} {
  func.func @_mlp_resident_kernel(%arg0: i32, %arg1: memref<16x32xf32, #tpu.memory_space<vmem>>, %arg2: memref<32x128xf32, #tpu.memory_space<vmem>>, %arg3: memref<1x128xf32, #tpu.memory_space<vmem>>, %arg4: memref<128x32xf32, #tpu.memory_space<vmem>>, %arg5: memref<1x32xf32, #tpu.memory_space<vmem>>, %arg6: memref<16x32xf32, #tpu.memory_space<vmem>>) attributes {dimension_semantics = [#tpu.dimension_semantics<parallel>], iteration_bounds = array<i64: 1>, scalar_prefetch = 0 : i64, scratch_operands = 0 : i64, tpu.core_type = #tpu.core_type<tc>, window_params = [{transform_indices = @transform_0, window_bounds = array<i64: 16, 32>}, {pipeline_mode = #tpu.pipeline_mode<synchronous>, transform_indices = @transform_1, window_bounds = array<i64: 32, 128>}, {pipeline_mode = #tpu.pipeline_mode<synchronous>, transform_indices = @transform_2, window_bounds = array<i64: 1, 128>}, {pipeline_mode = #tpu.pipeline_mode<synchronous>, transform_indices = @transform_3, window_bounds = array<i64: 128, 32>}, {pipeline_mode = #tpu.pipeline_mode<synchronous>, transform_indices = @transform_4, window_bounds = array<i64: 1, 32>}, {transform_indices = @transform_5, window_bounds = array<i64: 16, 32>}]} {
    %c0 = arith.constant 0 : index
    %c0_0 = arith.constant 0 : index
    %0 = vector.load %arg1[%c0, %c0_0] : memref<16x32xf32, #tpu.memory_space<vmem>>, vector<16x32xf32>
    %c0_1 = arith.constant 0 : index
    %c0_2 = arith.constant 0 : index
    %1 = vector.load %arg2[%c0_1, %c0_2] : memref<32x128xf32, #tpu.memory_space<vmem>>, vector<32x128xf32>
    %cst = arith.constant dense<0.000000e+00> : vector<16x128xf32>
    %2 = tpu.matmul %0, %1, %cst {dimension_numbers = #tpu.dot_dimension_numbers<[1], [0], [0], [1], [0, 0, 1, 1], [], []>} : vector<16x32xf32>, vector<32x128xf32>, vector<16x128xf32> -> vector<16x128xf32>
    %c0_3 = arith.constant 0 : index
    %c0_4 = arith.constant 0 : index
    %3 = vector.load %arg3[%c0_3, %c0_4] : memref<1x128xf32, #tpu.memory_space<vmem>>, vector<1x128xf32>
    %4 = vector.broadcast %3 : vector<1x128xf32> to vector<16x128xf32>
    %5 = arith.addf %2, %4 : vector<16x128xf32>
    %cst_5 = arith.constant 5.000000e-01 : f32
    %6 = vector.broadcast %cst_5 : f32 to vector<16x128xf32>
    %7 = arith.mulf %6, %5 : vector<16x128xf32>
    %cst_6 = arith.constant 0.707106769 : f32
    %8 = vector.broadcast %cst_6 : f32 to vector<16x128xf32>
    %9 = arith.mulf %5, %8 : vector<16x128xf32>
    %10 = math.erf %9 : vector<16x128xf32>
    %cst_7 = arith.constant 1.000000e+00 : f32
    %11 = vector.broadcast %cst_7 : f32 to vector<16x128xf32>
    %12 = arith.addf %11, %10 : vector<16x128xf32>
    %13 = arith.mulf %7, %12 : vector<16x128xf32>
    %c0_8 = arith.constant 0 : index
    %c0_9 = arith.constant 0 : index
    %14 = vector.load %arg4[%c0_8, %c0_9] : memref<128x32xf32, #tpu.memory_space<vmem>>, vector<128x32xf32>
    %cst_10 = arith.constant dense<0.000000e+00> : vector<16x32xf32>
    %15 = tpu.matmul %13, %14, %cst_10 {dimension_numbers = #tpu.dot_dimension_numbers<[1], [0], [0], [1], [0, 0, 1, 1], [], []>} : vector<16x128xf32>, vector<128x32xf32>, vector<16x32xf32> -> vector<16x32xf32>
    %c0_11 = arith.constant 0 : index
    %c0_12 = arith.constant 0 : index
    %16 = vector.load %arg5[%c0_11, %c0_12] : memref<1x32xf32, #tpu.memory_space<vmem>>, vector<1x32xf32>
    %17 = vector.broadcast %16 : vector<1x32xf32> to vector<16x32xf32>
    %18 = arith.addf %15, %17 : vector<16x32xf32>
    %c0_13 = arith.constant 0 : index
    %c0_14 = arith.constant 0 : index
    %19 = vector.load %arg6[%c0_13, %c0_14] : memref<16x32xf32, #tpu.memory_space<vmem>>, vector<16x32xf32>
    tpu.vector_store %arg6[%c0_13, %c0_14], %18 {strides = array<i32>} : memref<16x32xf32, #tpu.memory_space<vmem>>, vector<16x32xf32>,
    return
  }
  func.func @transform_0(%arg0: i32) -> (i32, i32) {
    %c0_i32 = arith.constant 0 : i32
    %c0_i32_0 = arith.constant 0 : i32
    return %arg0, %c0_i32 : i32, i32
  }
  func.func @transform_1(%arg0: i32) -> (i32, i32) {
    %c0_i32 = arith.constant 0 : i32
    %c0_i32_0 = arith.constant 0 : i32
    %c0_i32_1 = arith.constant 0 : i32
    return %c0_i32, %c0_i32_0 : i32, i32
  }
  func.func @transform_2(%arg0: i32) -> (i32, i32) {
    %c0_i32 = arith.constant 0 : i32
    %c0_i32_0 = arith.constant 0 : i32
    %c0_i32_1 = arith.constant 0 : i32
    return %c0_i32, %c0_i32_0 : i32, i32
  }
  func.func @transform_3(%arg0: i32) -> (i32, i32) {
    %c0_i32 = arith.constant 0 : i32
    %c0_i32_0 = arith.constant 0 : i32
    %c0_i32_1 = arith.constant 0 : i32
    return %c0_i32, %c0_i32_0 : i32, i32
  }
  func.func @transform_4(%arg0: i32) -> (i32, i32) {
    %c0_i32 = arith.constant 0 : i32
    %c0_i32_0 = arith.constant 0 : i32
    %c0_i32_1 = arith.constant 0 : i32
    return %c0_i32, %c0_i32_0 : i32, i32
  }
  func.func @transform_5(%arg0: i32) -> (i32, i32) {
    %c0_i32 = arith.constant 0 : i32
    %c0_i32_0 = arith.constant 0 : i32
    return %arg0, %c0_i32 : i32, i32
  }
}

</mosaic_0001>

<bundles_post_ra>
// kernel: tpu_custom_call.1
= control target key start
LH: loop header
LB: loop body
LE: loop exit
PB: predicated region body
PF: predicated region fallthrough
CT: control target
= control target key end

     0   :  { %vm34_vm0 = vcmask 261120   ;;  %s508_s0 = inlined_call_operand.vmem [shape: f32[16,32], index: 0, kind: input, shape index: {}]   ;;  %s509_s1 = inlined_call_operand.vmem [shape: f32[32,128], index: 1, kind: input, shape index: {}]   ;;  %s510_s2 = inlined_call_operand.vmem [shape: f32[1,128], index: 2, kind: input, shape index: {}]   ;;  %s511_s3 = inlined_call_operand.vmem [shape: f32[128,32], index: 3, kind: input, shape index: {}]   ;;  %s512_s4 = inlined_call_operand.vmem [shape: f32[1,32], index: 4, kind: input, shape index: {}]   ;;  %s513_s5 = inlined_call_operand.hbm [shape: f32[16,32], index: 5, kind: output, shape index: {}]  }
   0x1   :  { %v23_v0 = vld [vmem:[%s509_s1] sm:$0xff]  ;;  %v24_v1 = vld [vmem:[%s509_s1 + $0x8] sm:$0xff]  ;;  %v25_v2 = vld [vmem:[%s509_s1 + $0x10] sm:$0xff] }
   0x2   :  { %v316_v3 = vpack.c.bf16 %v24_v1, %v23_v0  ;;  %v26_v4 = vld [vmem:[%s509_s1 + $0x18] sm:$0xff]  ;;  %v21_v5 = vld [vmem:[%s508_s0] sm:$0xff]  ;;  %v127_v8 = vld [vmem:[%s511_s3 + $0x8] sm:$0xff] }
   0x3   :  { %v320_v6 = vpack.c.bf16 %v26_v4, %v25_v2  ;;  %278 = vmatprep.mubr.msk.f32.mxu0 %vm34_vm0, %v21_v5  ;;  %v126_v7 = vld [vmem:[%s511_s3] sm:$0xff]  ;;  %v128_v9 = vld [vmem:[%s511_s3 + $0x10] sm:$0xff]  ;;  %v129_v11 = vld [vmem:[%s511_s3 + $0x18] sm:$0xff] }
   0x4   :  { %317 = vmatprep.subr.bf16.mxu0 %v316_v3  ;;  %v324_v10 = vpack.c.bf16 %v127_v8, %v126_v7  ;;  %v328_v12 = vpack.c.bf16 %v129_v11, %v128_v9  ;;  %v130_v13 = vld [vmem:[%s511_s3 + $0x20] sm:$0xff]  ;;  %v131_v14 = vld [vmem:[%s511_s3 + $0x28] sm:$0xff] }
   0x5   :  { %319 = vmatpush3.bf16.msra.mxu0 %v316_v3 }
   0x6   :  { %10 = vsyncpa [#allocation3], 0  ;;  %321 = vmatprep.subr.bf16.mxu0 %v320_v6  ;;  %325 = vmatprep.subr.bf16.mxu1 %v324_v10  ;;  %v332_v15 = vpack.c.bf16 %v131_v14, %v130_v13  ;;  %v22_v16 = vld [vmem:[%s508_s0 + $0x8] sm:$0xff]  ;;  %v132_v17 = vld [vmem:[%s511_s3 + $0x30] sm:$0xff]  ;;  %s387_s11 = smov [#allocation2]  }
   0x7   :  { %327 = vmatpush3.bf16.msra.mxu1 %v324_v10  ;;  %v133_v18 = vld [vmem:[%s511_s3 + $0x38] sm:$0xff]  ;;  %v134_v20 = vld [vmem:[%s511_s3 + $0x40] sm:$0xff]  ;;  %v135_v21 = vld [vmem:[%s511_s3 + $0x48] sm:$0xff]  ;;  %s231_s12 = sshll.u32 %s387_s11, 4  ;;  %s232_s12 = int_to_ptr.vmem [resolvable:$true] %s231_s12 }
   0x8   :  { %329 = vmatprep.subr.bf16.mxu1 %v328_v12  ;;  %v336_v19 = vpack.c.bf16 %v133_v18, %v132_v17  ;;  %v340_v22 = vpack.c.bf16 %v135_v21, %v134_v20  ;;  %v136_v23 = vld [vmem:[%s511_s3 + $0x50] sm:$0xff]  ;;  %v137_v24 = vld [vmem:[%s511_s3 + $0x58] sm:$0xff]  ;;  %v138_v26 = vld [vmem:[%s511_s3 + $0x60] sm:$0xff]  ;;  %s363_s13 = scalar_lea.vmem %s232_s12, 256  ;;  %p368_p1 = scmp.lt.s32.totalorder %s232_s12, %s232_s12 }
   0x9   :  { %323 = vmatpush3.bf16.msra.mxu0 %v320_v6  ;;  %v344_v25 = vpack.c.bf16 %v137_v24, %v136_v23  ;;  %v139_v27 = vld [vmem:[%s511_s3 + $0x68] sm:$0xff]  ;;  %v140_v29 = vld [vmem:[%s511_s3 + $0x70] sm:$0xff]  ;;  %v141_v30 = vld [vmem:[%s511_s3 + $0x78] sm:$0xff]  ;;  %p364_p0 = scmp.ne.s32.totalorder %s232_s12, %s363_s13  ;;  %p369_p2 = scmp.lt.s32.totalorder %s363_s13, %s363_s13 }
   0xa   :  { %v348_v28 = vpack.c.bf16 %v139_v27, %v138_v26  ;;  %v352_v31 = vpack.c.bf16 %v141_v30, %v140_v29  ;;  %v242_v32 = vld [vmem:[%s510_s2] ss:$0 sm:$0xff] }
   0xb   :  { %331 = vmatpush3.bf16.msra.mxu1 %v328_v12  ;;  %v245_v47 = vld [vmem:[%s512_s4] ss:$0 sm:$0xff]  ;;  %p370_p3 = por %p369_p2, %p368_p1 }
   0xc   :  { %279 = vmatmul.mubr.msk.f32.vlgmr.msra.gmra.mrb[0].mxu0 %vm34_vm0, %v22_v16  ;;  %333 = vmatprep.subr.bf16.mxu1 %v332_v15 }
   0xd   :  { %p371_p4 = pnand %p370_p3, %p364_p0 }
   0xf   :  { %335 = vmatpush3.bf16.msra.mxu1 %v332_v15 }
  0x10   :  { %337 = vmatprep.subr.bf16.mxu1 %v336_v19 }
  0x13   :  { %339 = vmatpush3.bf16.msra.mxu1 %v336_v19 }
  0x14   :  { %341 = vmatprep.subr.bf16.mxu1 %v340_v22 }
  0x17   :  { %343 = vmatpush3.bf16.msra.mxu1 %v340_v22 }
  0x18   :  { %345 = vmatprep.subr.bf16.mxu1 %v344_v25 }
  0x1b   :  { %347 = vmatpush3.bf16.msra.mxu1 %v344_v25 }
  0x1c   :  { %349 = vmatprep.subr.bf16.mxu1 %v348_v28 }
  0x1f   :  { %351 = vmatpush3.bf16.msra.mxu1 %v348_v28 }
  0x20   :  { %353 = vmatprep.subr.bf16.mxu1 %v352_v31 }
  0x23   :  { %355 = vmatpush3.bf16.msra.mxu1 %v352_v31 }
  0xdf   :  { %v280_v33 = vpop.f32.mrb[0].mxu0 }
  0xe0   :  { %v113_v34 = vadd.f32 %v280_v33, %v242_v32  ;;  %v107_v35 = vpop.f32.mrb[1].mxu0 }
  0xe1   :  { %v108_v36 = vadd.f32 %v242_v32, %v107_v35 }
  0xe2   :  { %v119_v37 = vmul.f32 0.70710677, %v113_v34  ;;  %v117_v44 = vmul.f32 0.5, %v113_v34 }
  0xe3   :  { %v118_v38 = vmul.f32 0.70710677, %v108_v36  ;;  %v116_v42 = vmul.f32 0.5, %v108_v36 }
  0xe4   :  { %359 = verf.f32 %v119_v37 }
  0xe5   :  { %361 = verf.f32 %v118_v38 }
  0xee   :  { %v360_v39 = vpop.eup %359 }
  0xef   :  { %v362_v40 = vpop.eup %361  ;;  %v123_v41 = vadd.f32 1.0, %v360_v39 }
  0xf0   :  { %v122_v43 = vadd.f32 1.0, %v362_v40 }
  0xf1   :  { %v125_v46 = vmul.f32 %v123_v41, %v117_v44 }
  0xf2   :  { %v124_v45 = vmul.f32 %v122_v43, %v116_v42 }
  0xf4   :  { %313 = vmatprep.mubr.f32.mxu1 %v124_v45 }
  0xf5   :  { %314 = vmatmul.mubr.f32.vlgmr.msra.gmra.mrb[0].mxu1 %v125_v46 }
 0x1c8   :  { %v315_v48 = vpop.f32.mrb[0].mxu1 }
 0x1c9   :  { %v221_v49 = vadd.f32 %v315_v48, %v245_v47  ;;  %v215_v50 = vpop.f32.mrb[1].mxu1 }
 0x1ca   :  { %v216_v51 = vadd.f32 %v245_v47, %v215_v50 }
 0x1cb   :  { %225 = vst.msk [vmem:[#allocation2 + $0x8] sm:$0xff] %vm34_vm0, %v221_v49 }
 0x1cc   :  { %224 = vst.msk [vmem:[#allocation2] sm:$0xff] %vm34_vm0, %v216_v51 }
 0x1cd   :  { %374 = shalt.err (!%p371_p4)
}
 0x1ce   :  { %s375_s15 = scalar_lea.hbm %s513_s5, 256 }
 0x1cf   :  { %p376_p5 = scmp.ne.s32.totalorder %s513_s5, %s375_s15  ;;  %p379_p6 = scmp.lt.u32.totalorder %s375_s15, %s513_s5 }
 0x1d1   :  { %p381_p7 = pnand %p379_p6, %p376_p5 }
 0x1d3   :  { %384 = shalt.err (!%p381_p7)
}
 0x1d4   :  { %s388_s20 = smov 128   ;;  %s389_s21 = smov 8  }
 0x1d5   :  { %237 = dma.vmem_to_hbm [thread:$0]  %s232_s12, 256, %s513_s5, [#allocation3], %s388_s20, %s388_s20, %s389_s21  }
 0x1d6   :  { %385 = dma.done.wait [#allocation3], 256  }
 0x1d7   :  { %386 = vsyncadd [#allocation3], 4294967040 }
 0x1d8   :  { %241 = vsyncpa [#allocation3], 1 }

</bundles_post_ra>
